<compile_context>
chip_gen: v6e
topology: v6e:2x2x1
jax: 0.10.0
libtpu: 0.0.40
codegen_flags: <defaults>
</compile_context>

<pallas_src>
import jax
import jax.numpy as jnp
from jax import lax
from jax.experimental import pallas as pl
from jax.experimental.pallas import tpu as pltpu


_NRING = 4  # DMA semaphores kept in flight


def _zero_rows_kernel(count_ref, rows_ref, sig_ref, out_ref, zero_ref, sems):
    """Write-only pass: DMA a block of zeros onto each turned-off row.

    count_ref: SMEM (1,)   int32  -- number of turned-off rows
    rows_ref:  SMEM (n,)   int32  -- compacted turned-off row indices (padded)
    sig_ref:   HBM  (n, l)        -- input signals (aliased to out_ref; unread)
    out_ref:   HBM  (n, l)        -- output (same HBM buffer as sig_ref)
    zero_ref:  VMEM (1, l)        -- zero source block
    sems:      DMA semaphores (_NRING,)
    """
    del sig_ref  # aliased to out_ref; kept rows are never read nor written
    zero_ref[...] = jnp.zeros_like(zero_ref)
    cnt = count_ref[0]

    def _start(i, slot):
        row = rows_ref[i]
        pltpu.make_async_copy(
            zero_ref, out_ref.at[pl.ds(row, 1), :], sems.at[slot]).start()

    def _wait(slot):
        # Wait only needs the semaphore + transfer size; a row-0 view of the
        # same-shaped destination is the standard "wait descriptor" idiom.
        pltpu.make_async_copy(
            zero_ref, out_ref.at[pl.ds(0, 1), :], sems.at[slot]).wait()

    def _body(i, carry):
        slot = i % _NRING

        @pl.when(i >= _NRING)
        def _():
            _wait(slot)  # retire the DMA that used this slot _NRING steps ago

        _start(i, slot)
        return carry

    lax.fori_loop(0, cnt, _body, 0)

    def _drain(i, carry):
        _wait(i % _NRING)
        return carry

    lax.fori_loop(jnp.maximum(cnt - _NRING, 0), cnt, _drain, 0)


def _turn_off_mask(key: jax.Array, num_signals: int, p: float) -> jax.Array:
    """Matches torch.rand(num_signals) < p: one uniform draw per row."""
    return jax.random.uniform(key, (num_signals,)) < jnp.float32(p)


def random_turn_off(signals: jax.Array, p: float, key: jax.Array) -> jax.Array:
    """Zero out each row of `signals` independently with probability `p`.

    Note: the signals HBM buffer is aliased to the output.  For true in-place
    behaviour donate `signals` at the enclosing jit boundary; otherwise XLA
    inserts a defensive copy (correct either way).
    """
    n, l = signals.shape

    turn_off = _turn_off_mask(key, n, p)                        # (n,) bool
    count = jnp.sum(turn_off, dtype=jnp.int32).reshape(1)       # (1,) int32
    rows = jnp.nonzero(turn_off, size=n, fill_value=0)[0].astype(jnp.int32)

    itemsize = jnp.dtype(signals.dtype).itemsize
    cost = pl.CostEstimate(
        flops=0,
        transcendentals=0,
        bytes_accessed=max(l * itemsize, int(p * n * l * itemsize)),
    )

    return pl.pallas_call(
        _zero_rows_kernel,
        out_shape=jax.ShapeDtypeStruct((n, l), signals.dtype),
        in_specs=[
            pl.BlockSpec(memory_space=pltpu.MemorySpace.SMEM),  # count
            pl.BlockSpec(memory_space=pltpu.MemorySpace.SMEM),  # off-row idx
            pl.BlockSpec(memory_space=pl.ANY),                  # signals (HBM)
        ],
        out_specs=pl.BlockSpec(memory_space=pl.ANY),
        scratch_shapes=[
            pltpu.VMEM((1, l), signals.dtype),                  # zero block
            pltpu.SemaphoreType.DMA((_NRING,)),
        ],
        input_output_aliases={2: 0},      # signals buffer reused as the output
        compiler_params=pltpu.CompilerParams(has_side_effects=True),
        cost_estimate=cost,
    )(count, rows, signals)


if __name__ == "__main__":
    root = jax.random.PRNGKey(0)
    sig_key, mask_key = jax.random.split(root)

    num_signals, length = 16, 512
    p = 0.5

    signals = jax.random.normal(sig_key, (num_signals, length), dtype=jnp.float32)

    # Reference computed BEFORE the kernel call (the kernel aliases its input
    # buffer).  Uses the identical mask computation so the comparison is exact.
    turn_off_ref = _turn_off_mask(mask_key, num_signals, p)
    expected = jnp.where(turn_off_ref[:, None], jnp.float32(0.0), signals)
    expected = jax.block_until_ready(expected)

    out = random_turn_off(signals, p=p, key=mask_key)
    out = jax.block_until_ready(out)

    assert out.shape == expected.shape and out.dtype == expected.dtype
    assert bool(jnp.all(out == expected)), "kernel output must match JAX reference"

    # Every row is either exactly the original row or all zeros.
    row_zero = jnp.all(out == 0.0, axis=1)
    row_same = jnp.all(out == expected, axis=1)
    assert bool(jnp.all(row_zero | row_same)), "rows must be passthrough or zeroed"

    # Sanity: with p=0.5 over 16 rows we expect at least one row of each kind.
    assert bool(jnp.any(row_zero)) and bool(jnp.any(~row_zero))

    print("KERNEL_OK")
</pallas_src>

<mosaic_0001>
module attributes {stable_mosaic.version = 11 : i64} {
  func.func @_zero_rows_kernel(%arg0: memref<1xi32, #tpu.memory_space<smem>>, %arg1: memref<16xi32, #tpu.memory_space<smem>>, %arg2: memref<16x512xf32, #tpu.memory_space<any>>, %arg3: memref<16x512xf32, #tpu.memory_space<any>>, %arg4: memref<1x512xf32, #tpu.memory_space<vmem>>, %arg5: memref<4x!tpu.dma_semaphore, #tpu.memory_space<semaphore_mem>>) attributes {dimension_semantics = [], scalar_prefetch = 0 : i64, scratch_operands = 2 : i64, tpu.core_type = #tpu.core_type<tc>} {
    %cst = arith.constant 0.000000e+00 : f32
    %0 = vector.broadcast %cst : f32 to vector<1x512xf32>
    %c0 = arith.constant 0 : index
    %c0_0 = arith.constant 0 : index
    %1 = vector.load %arg4[%c0, %c0_0] : memref<1x512xf32, #tpu.memory_space<vmem>>, vector<1x512xf32>
    tpu.vector_store %arg4[%c0, %c0_0], %0 {strides = array<i32>} : memref<1x512xf32, #tpu.memory_space<vmem>>, vector<1x512xf32>,
    %c0_1 = arith.constant 0 : index
    %2 = memref.load %arg0[%c0_1] : memref<1xi32, #tpu.memory_space<smem>>
    %c0_i32 = arith.constant 0 : i32
    %c0_i32_2 = arith.constant 0 : i32
    %3 = arith.subi %2, %c0_i32_2 : i32
    %4 = arith.addi %c0_i32_2, %3 : i32
    %c1_i32 = arith.constant 1 : i32
    scf.for %arg6 = %c0_i32_2 to %4 step %c1_i32  : i32 {
      %c4_i32_6 = arith.constant 4 : i32
      %c0_i32_7 = arith.constant 0 : i32
      %9 = arith.cmpi eq, %c4_i32_6, %c0_i32_7 : i32
      %c1_i32_8 = arith.constant 1 : i32
      %10 = arith.select %9, %c1_i32_8, %c4_i32_6 : i32
      %11 = arith.remsi %arg6, %10 : i32
      %c0_i32_9 = arith.constant 0 : i32
      %12 = arith.cmpi ne, %11, %c0_i32_9 : i32
      %c0_i32_10 = arith.constant 0 : i32
      %13 = arith.cmpi slt, %11, %c0_i32_10 : i32
      %c0_i32_11 = arith.constant 0 : i32
      %14 = arith.cmpi slt, %10, %c0_i32_11 : i32
      %15 = arith.xori %13, %14 : i1
      %16 = arith.andi %15, %12 : i1
      %17 = arith.addi %11, %10 : i32
      %18 = arith.select %16, %17, %11 : i32
      %c4_i32_12 = arith.constant 4 : i32
      %19 = arith.cmpi sge, %arg6, %c4_i32_12 : i32
      %20 = arith.extui %19 : i1 to i32
      %c0_i32_13 = arith.constant 0 : i32
      %21 = arith.cmpi ne, %20, %c0_i32_13 : i32
      scf.if %21 {
        %c0_i32_15 = arith.constant 0 : i32
        %c0_i32_16 = arith.constant 0 : i32
        %27 = tpu.memref_slice %arg3[%c0_i32_15, %c0_i32_16] : memref<16x512xf32, #tpu.memory_space<any>> -> memref<1x512xf32, #tpu.memory_space<any>>
        %28 = tpu.memref_slice %arg5[%18] : memref<4x!tpu.dma_semaphore, #tpu.memory_space<semaphore_mem>> -> memref<1x!tpu.dma_semaphore, #tpu.memory_space<semaphore_mem>>
        %29 = tpu.memref_squeeze %28 : memref<1x!tpu.dma_semaphore, #tpu.memory_space<semaphore_mem>> -> memref<!tpu.dma_semaphore, #tpu.memory_space<semaphore_mem>>
        tpu.wait_dma2 semaphore(%29 : memref<!tpu.dma_semaphore, #tpu.memory_space<semaphore_mem>>) src(%arg4 : memref<1x512xf32, #tpu.memory_space<vmem>>) dst(%27 : memref<1x512xf32, #tpu.memory_space<any>>)
      } else {
      }
      %22 = arith.index_cast %arg6 : i32 to index
      %23 = memref.load %arg1[%22] : memref<16xi32, #tpu.memory_space<smem>>
      %c0_i32_14 = arith.constant 0 : i32
      %24 = tpu.memref_slice %arg3[%23, %c0_i32_14] : memref<16x512xf32, #tpu.memory_space<any>> -> memref<1x512xf32, #tpu.memory_space<any>>
      %25 = tpu.memref_slice %arg5[%18] : memref<4x!tpu.dma_semaphore, #tpu.memory_space<semaphore_mem>> -> memref<1x!tpu.dma_semaphore, #tpu.memory_space<semaphore_mem>>
      %26 = tpu.memref_squeeze %25 : memref<1x!tpu.dma_semaphore, #tpu.memory_space<semaphore_mem>> -> memref<!tpu.dma_semaphore, #tpu.memory_space<semaphore_mem>>
      tpu.enqueue_dma source(%arg4 : memref<1x512xf32, #tpu.memory_space<vmem>>) target(%24 : memref<1x512xf32, #tpu.memory_space<any>>) target_semaphore(%26 : memref<!tpu.dma_semaphore, #tpu.memory_space<semaphore_mem>>)
    }
    %c4_i32 = arith.constant 4 : i32
    %5 = arith.subi %2, %c4_i32 : i32
    %c0_i32_3 = arith.constant 0 : i32
    %6 = arith.maxsi %5, %c0_i32_3 : i32
    %c0_i32_4 = arith.constant 0 : i32
    %7 = arith.subi %2, %6 : i32
    %8 = arith.addi %6, %7 : i32
    %c1_i32_5 = arith.constant 1 : i32
    scf.for %arg6 = %6 to %8 step %c1_i32_5  : i32 {
      %c4_i32_6 = arith.constant 4 : i32
      %c0_i32_7 = arith.constant 0 : i32
      %9 = arith.cmpi eq, %c4_i32_6, %c0_i32_7 : i32
      %c1_i32_8 = arith.constant 1 : i32
      %10 = arith.select %9, %c1_i32_8, %c4_i32_6 : i32
      %11 = arith.remsi %arg6, %10 : i32
      %c0_i32_9 = arith.constant 0 : i32
      %12 = arith.cmpi ne, %11, %c0_i32_9 : i32
      %c0_i32_10 = arith.constant 0 : i32
      %13 = arith.cmpi slt, %11, %c0_i32_10 : i32
      %c0_i32_11 = arith.constant 0 : i32
      %14 = arith.cmpi slt, %10, %c0_i32_11 : i32
      %15 = arith.xori %13, %14 : i1
      %16 = arith.andi %15, %12 : i1
      %17 = arith.addi %11, %10 : i32
      %18 = arith.select %16, %17, %11 : i32
      %c0_i32_12 = arith.constant 0 : i32
      %c0_i32_13 = arith.constant 0 : i32
      %19 = tpu.memref_slice %arg3[%c0_i32_12, %c0_i32_13] : memref<16x512xf32, #tpu.memory_space<any>> -> memref<1x512xf32, #tpu.memory_space<any>>
      %20 = tpu.memref_slice %arg5[%18] : memref<4x!tpu.dma_semaphore, #tpu.memory_space<semaphore_mem>> -> memref<1x!tpu.dma_semaphore, #tpu.memory_space<semaphore_mem>>
      %21 = tpu.memref_squeeze %20 : memref<1x!tpu.dma_semaphore, #tpu.memory_space<semaphore_mem>> -> memref<!tpu.dma_semaphore, #tpu.memory_space<semaphore_mem>>
      tpu.wait_dma2 semaphore(%21 : memref<!tpu.dma_semaphore, #tpu.memory_space<semaphore_mem>>) src(%arg4 : memref<1x512xf32, #tpu.memory_space<vmem>>) dst(%19 : memref<1x512xf32, #tpu.memory_space<any>>)
    }
    return
  }
}

</mosaic_0001>

<bundles_post_ra>
// kernel: tpu_custom_call.1
= control target key start
LH: loop header
LB: loop body
LE: loop exit
PB: predicated region body
PF: predicated region fallthrough
CT: control target
= control target key end

     0   :  { %9 = vsyncpa [#allocation6], 0  ;;  %s317_s0 = inlined_call_operand.<no memory space> [shape: s32[1], index: 0, kind: input, shape index: {}]   ;;  %s318_s1 = inlined_call_operand.vmem [shape: s32[16], index: 1, kind: input, shape index: {}]   ;;  %s319_s2 = inlined_call_operand.hbm [shape: f32[16,512], index: 2, kind: input, shape index: {}, may-alias: {2,3}]   ;;  %s320_s3 = inlined_call_operand.hbm [shape: f32[16,512], index: 3, kind: output, shape index: {}, may-alias: {2,3}]  }
   0x1   :  { %s18_s14 = sshll.u32 %s318_s1, 4  ;;  %s19_s14 = int_to_ptr.vmem [resolvable:$true] %s18_s14 }
   0x2   :  { %s181_s15 = scalar_lea.vmem %s19_s14, 16  ;;  %p186_p1 = scmp.lt.s32.totalorder %s19_s14, %s19_s14 }
   0x3   :  { %p182_p0 = scmp.ne.s32.totalorder %s19_s14, %s181_s15  ;;  %p187_p2 = scmp.lt.s32.totalorder %s181_s15, %s181_s15 }
   0x5   :  { %p188_p3 = por %p187_p2, %p186_p1 }
   0x7   :  { %p189_p4 = pnand %p188_p3, %p182_p0 }
   0x9   :  { %192 = shalt.err (!%p189_p4)
}
   0xa   :  { %s239_s16 = smov [#allocation5]  }
   0xb   :  { %21 = dma.vmem_to_smem %s19_s14, 16, %s239_s16, [#allocation6]  }
   0xc   :  { %223 = dma.done.wait [#allocation6], 16  }
   0xd   :  { %224 = vsyncadd [#allocation6], 4294967280 }
   0xe   :  { %25 = sfence }
   0xf   :  { %v26_v0 = vlaneseq  ;;  %v240_v1 = vmov 0.0   ;;  %p141_p5 = scmp.le.s32.totalorder %s317_s0, 0 }
  0x10   :  { %s271_s1 = smov (!%p141_p5), 0  }
  0x11   :  { %vm28_vm0 = vcmp.lt.s32.totalorder %v26_v0, 512  ;;  %133 = sbr.rel (%p141_p5) target bundleno = 63 (0x3f), region = 43 }
  0x12   :  { %30 = vst.msk [vmem:[#allocation2] sm:$0xf] %vm28_vm0, %v240_v1 }
  0x16 LB: > { %p38_p6 = scmp.lt.s32.totalorder %s233_s1, 0  ;;  %s39_s18 = ssub.s32 0, %s233_s1  ;;  %s233_s1 = sphi %s271_s1, %s35_s1  }
  0x17   : > { %s142_s19 = smin.u32 %s233_s1, %s39_s18  ;;  %p158_p7 = scmp.ge.s32.totalorder %s233_s1, 4 }
  0x18   : > { %s41_s20 = sand.u32 3, %s142_s19  }
  0x19   : > { %s42_s21 = ssub.s32 0, %s41_s20 }
  0x1a   : > { %s322_s21 = smov (!%p38_p6, %s42_s21), %s41_s20 }
  0x1b   : > { %p144_p8 = scmp.lt.s32.totalorder %s322_s21, 0  ;;  %s48_s22 = sadd.s32 4, %s322_s21 }
  0x1d   : > { %s324_s22 = smov (!%p144_p8, %s48_s22), %s322_s21 }
  0x1e   : > { %s280_s23 = scalar_lea.sflag [#allocation3], %s324_s22 }
  0x1f   : > { %226 = dma.done.wait (%p158_p7), %s280_s23, 64 }
  0x20   : > { %228 = vsyncadd (%p158_p7), %s280_s23, 4294967232  ;;  %s58_s24 = sld [smem:[#allocation5 + %s233_s1]]  ;;  %s241_s25 = smov [#allocation2]  }
  0x21   : > { %s67_s26 = sshll.u32 %s241_s25, 4  ;;  %s285_s26 = int_to_ptr.vmem [resolvable:$true] %s67_s26 }
  0x22   : > { %s193_s8 = scalar_lea.vmem %s285_s26, 64  ;;  %p198_p10 = scmp.lt.s32.totalorder %s285_s26, %s285_s26 }
  0x23   : > { %p194_p9 = scmp.ne.s32.totalorder %s285_s26, %s193_s8  ;;  %p199_p11 = scmp.lt.s32.totalorder %s193_s8, %s193_s8 }
  0x25   : > { %p200_p12 = por %p199_p11, %p198_p10 }
  0x26   : > { %s59_s27 = sshrl.u32 %s58_s24, 3  ;;  %s60_s28 = sand.u32 7, %s58_s24  }
  0x27   : > { %s146_s29 = sshll.u32 %s59_s27, 5  ;;  %p201_p13 = pnand %p200_p12, %p194_p9 }
  0x28   : > { %s62_s30 = sadd.s32 %s146_s29, %s60_s28 }
  0x29   : > { %s147_s4 = sshll.u32 %s62_s30, 4 }
  0x2a   : > { %s64_s7 = scalar_lea.hbm %s320_s3, %s147_s4 }
  0x2b   : > { %204 = shalt.err (!%p201_p13)  }
  0x2c   : > { %s205_s9 = scalar_lea.hbm %s64_s7, 64  ;;  %s207_s12 = scalar_lea.hbm %s320_s3, 1024 }
  0x2d   : > { %p206_p0 = scmp.ne.s32.totalorder %s64_s7, %s205_s9  ;;  %p208_p1 = scmp.lt.s32.totalorder %s64_s7, %s320_s3 }
  0x2e   : > { %p209_p2 = scmp.lt.s32.totalorder %s207_s12, %s205_s9 }
  0x30   : > { %p210_p3 = por %p209_p2, %p208_p1 }
  0x32   : > { %p211_p4 = pnand %p210_p3, %p206_p0 }
  0x34   : > { %214 = shalt.err (!%p211_p4)  }
  0x35   : > { %s242_s15 = smov 16   ;;  %s243_s16 = smov 128  }
  0x36   : > { %s244_s2 = smov 1   ;;  %s35_s1 = sadd.s32 1, %s233_s1  }
  0x37   : > { %70 = dma.vmem_to_hbm [thread:$0]  %s285_s26, 64, %s64_s7, %s280_s23, %s242_s15, %s243_s16, %s244_s2 }
  0x38   : > { %p34_p5 = scmp.ge.s32.totalorder %s35_s1, %s317_s0 }
  0x3a   :  { %37 = sbr.rel (!%p34_p5) target bundleno = 22 (0x16), region = 49 }
  0x3f PF:  { %s148_s21 = sadd.s32 4294967292, %s317_s0 }
  0x40   :  { %p72_p6 = scmp.gt.s32.totalorder %s148_s21, 0 }
  0x42   :  { %s326_s21 = smov (!%p72_p6, %s148_s21), 0 }
  0x43   :  { %p137_p7 = scmp.ge.s32.totalorder %s326_s21, %s317_s0 }
  0x44   :  { %s235_s23 = smov (!%p137_p7), %s326_s21  }
  0x45   :  { %138 = sbr.rel (%p137_p7) target bundleno = 92 (0x5c), region = 54 }
  0x4a LB: > { %p80_p8 = scmp.lt.s32.totalorder %s237_s23, 0  ;;  %s81_s25 = ssub.s32 0, %s237_s23  ;;  %s237_s23 = sphi %s235_s23, %s77_s23  }
  0x4b   : > { %s149_s1 = smin.u32 %s237_s23, %s81_s25 }
  0x4c   : > { %s83_s26 = sand.u32 3, %s149_s1  }
  0x4d   : > { %s84_s3 = ssub.s32 0, %s83_s26 }
  0x4e   : > { %s328_s3 = smov (!%p80_p8, %s84_s3), %s83_s26 }
  0x4f   : > { %p151_p9 = scmp.lt.s32.totalorder %s328_s3, 0  ;;  %s90_s27 = sadd.s32 4, %s328_s3 }
  0x51   : > { %s330_s27 = smov (!%p151_p9, %s90_s27), %s328_s3 }
  0x52   : > { %s92_s28 = scalar_lea.sflag [#allocation3], %s330_s27 }
  0x53   : > { %229 = dma.done.wait %s92_s28, 64 }
  0x54   : > { %230 = vsyncadd %s92_s28, 4294967232  ;;  %s77_s23 = sadd.s32 1, %s237_s23  }
  0x55   : > { %p76_p10 = scmp.ge.s32.totalorder %s77_s23, %s317_s0 }
  0x57   :  { %79 = sbr.rel (!%p76_p10) target bundleno = 74 (0x4a), region = 60 }
  0x5c PF:  { %96 = vsyncpa [#allocation6], 1 }
  0x5d   :  { %97 = vsyncmov [#allocation3] }
  0x60   :  { %s98_s4 = vpop.sfrf %97 }
  0x61   :  { %p152_p11 = scmp.ne.s32.totalorder %s98_s4, 0 }
  0x63   :  { %102 = shalt.err (%p152_p11)  }
  0x64   :  { %104 = vsyncmov [#allocation3 + $0x1] }
  0x67   :  { %s105_s5 = vpop.sfrf %104 }
  0x68   :  { %p153_p12 = scmp.ne.s32.totalorder %s105_s5, 0 }
  0x6a   :  { %109 = shalt.err (%p153_p12)  }
  0x6b   :  { %111 = vsyncmov [#allocation3 + $0x2] }
  0x6e   :  { %s112_s6 = vpop.sfrf %111 }
  0x6f   :  { %p154_p13 = scmp.ne.s32.totalorder %s112_s6, 0 }
  0x71   :  { %116 = shalt.err (%p154_p13)  }
  0x72   :  { %118 = vsyncmov [#allocation3 + $0x3] }
  0x75   :  { %s119_s7 = vpop.sfrf %118 }
  0x76   :  { %p155_p0 = scmp.ne.s32.totalorder %s119_s7, 0 }
  0x78   :  { %123 = shalt.err (%p155_p0)  }

</bundles_post_ra>
